<compile_context>
chip_gen: v7x
topology: tpu7x:2x2x1
jax: 0.10.0
libtpu: 0.0.40
codegen_flags: <defaults>
</compile_context>

<pallas_src>
import jax
import jax.numpy as jnp
from jax.experimental import pallas as pl
from jax.experimental.pallas import tpu as pltpu

_LANES = 128
_SUBLANES = 8
_GRANULE = _SUBLANES * _LANES          # 1024 samples fill one (8,128) vreg / feature


def _cdiv(a, b):
    return -(-a // b)


def _logreg_kernel(w1_ref, b1_ref, w2_ref, b2_ref, cf_ref, out_ref):
    # w1_ref : (H, K)       SMEM   clinical.weight
    # b1_ref : (1, H)       SMEM   clinical.bias
    # w2_ref : (N, H)       SMEM   classifier.weight
    # b2_ref : (1, N)       SMEM   classifier.bias
    # cf_ref : (K, S, 128)  VMEM   clinical_features^T; batch on (sublane, lane)
    # out_ref: (N, S, 128)  VMEM   logits^T; lane-dense unmasked stores
    K = cf_ref.shape[0]
    H = w1_ref.shape[0]
    N = w2_ref.shape[0]
    tile = cf_ref.shape[1:]                      # (S, 128) dense sample tiles

    cf = [cf_ref[k] for k in range(K)]           # K loads of (S, 128)

    # ---- layer 1: h_i = sigmoid(sum_k W1[i,k]*cf_k + b1[i]) -----------------
    # scalar splat from SMEM + unrolled VPU mul/add; sigmoid on the EUP slot.
    h = []
    for i in range(H):                           # H = 5, static unroll
        acc = jnp.full(tile, b1_ref[0, i], dtype=jnp.float32)
        for k in range(K):                       # K = 5, static unroll
            acc = acc + w1_ref[i, k] * cf[k]
        h.append(jax.nn.sigmoid(acc))

    # ---- layer 2: y_j = sum_i W2[j,i]*h_i + b2[j] ---------------------------
    for j in range(N):                           # N = 2, static unroll
        acc = jnp.full(tile, b2_ref[0, j], dtype=jnp.float32)
        for i in range(H):
            acc = acc + w2_ref[j, i] * h[i]
        out_ref[j] = acc                         # lane-dense (S, 128) store


def logistic_regression(clinical_features, w1, b1, w2, b2, *,
                        max_granules_per_step=64):
    """clinical_features: (B, 5); w1: (5, 5); b1: (5,); w2: (2, 5); b2: (2,)."""
    cf = clinical_features.astype(jnp.float32)
    B, K = cf.shape                      # K == 5
    H = w1.shape[0]                      # 5 hidden units
    N = w2.shape[0]                      # 2 logits

    # --- grid sizing over batch granules of 1024 samples ---------------------
    n_gran = _cdiv(B, _GRANULE)
    steps = _cdiv(n_gran, max_granules_per_step)
    steps = max(steps, min(n_gran, 2))           # >=2 steps => both v7x TCs busy
    gran_per_step = _cdiv(n_gran, steps)
    steps = _cdiv(n_gran, gran_per_step)         # drop empty trailing steps
    S = gran_per_step * _SUBLANES                # sublane extent per block
    b_pad = steps * S * _LANES

    # --- layout plumbing: batch -> (sublane, lane), features -> leading axis --
    cf_t = jnp.zeros((K, b_pad), jnp.float32).at[:, :B].set(cf.T)
    cf_blk = cf_t.reshape(K, b_pad // _LANES, _LANES)

    # --- parameters as small 2-D SMEM tables (scalar reads in-kernel) --------
    w1s = w1.astype(jnp.float32)                 # (H, K)
    b1s = b1.astype(jnp.float32).reshape(1, H)
    w2s = w2.astype(jnp.float32)                 # (N, H)
    b2s = b2.astype(jnp.float32).reshape(1, N)

    smem_spec = lambda: pl.BlockSpec(memory_space=pltpu.MemorySpace.SMEM)

    out = pl.pallas_call(
        _logreg_kernel,
        out_shape=jax.ShapeDtypeStruct((N, b_pad // _LANES, _LANES), jnp.float32),
        grid=(steps,),
        in_specs=[
            smem_spec(),                                        # w1
            smem_spec(),                                        # b1
            smem_spec(),                                        # w2
            smem_spec(),                                        # b2
            pl.BlockSpec((K, S, _LANES), lambda i: (0, i, 0)),  # cf streams
        ],
        out_specs=pl.BlockSpec((N, S, _LANES), lambda i: (0, i, 0)),
        compiler_params=pltpu.CompilerParams(
            dimension_semantics=("parallel",)),
    )(w1s, b1s, w2s, b2s, cf_blk)

    # (N, b_pad) -> slice padding -> (B, N)
    return out.reshape(N, b_pad)[:, :B].T


def _init_linear(key, out_features, in_features):
    # Deterministic init mimicking PyTorch's default Linear init:
    # U(-1/sqrt(in_features), 1/sqrt(in_features)) for weight and bias.
    kw, kb = jax.random.split(key)
    bound = 1.0 / (in_features ** 0.5)
    w = jax.random.uniform(kw, (out_features, in_features),
                           minval=-bound, maxval=bound, dtype=jnp.float32)
    b = jax.random.uniform(kb, (out_features,),
                           minval=-bound, maxval=bound, dtype=jnp.float32)
    return w, b


if __name__ == "__main__":
    key = jax.random.PRNGKey(0)
    k_x, k_cf, k_l1, k_l2 = jax.random.split(key, 4)

    batch = 4
    # `x` is unused by the forward pass (kept only to mirror the signature).
    x_unused = jax.random.normal(k_x, (batch, 8), dtype=jnp.float32)
    clinical_features = jax.random.normal(k_cf, (batch, 5), dtype=jnp.float32)

    w1, b1 = _init_linear(k_l1, 5, 5)   # self.clinical   = nn.Linear(5, 5)
    w2, b2 = _init_linear(k_l2, 2, 5)   # self.classifier = nn.Linear(5, 2)

    out = logistic_regression(clinical_features, w1, b1, w2, b2)
    jax.block_until_ready(out)

    # Pure-JAX reference check of the fused kernel.
    ref = jax.nn.sigmoid(clinical_features @ w1.T + b1) @ w2.T + b2
    assert out.shape == (batch, 2)
    assert jnp.allclose(out, ref, atol=1e-5), "mismatch vs reference"

    print("KERNEL_OK")
</pallas_src>

<mosaic_0001>
module attributes {stable_mosaic.version = 11 : i64} {
  func.func @_logreg_kernel(%arg0: i32, %arg1: memref<5x5xf32, #tpu.memory_space<smem>>, %arg2: memref<1x5xf32, #tpu.memory_space<smem>>, %arg3: memref<2x5xf32, #tpu.memory_space<smem>>, %arg4: memref<1x2xf32, #tpu.memory_space<smem>>, %arg5: memref<5x8x128xf32, #tpu.memory_space<vmem>>, %arg6: memref<2x8x128xf32, #tpu.memory_space<vmem>>) attributes {dimension_semantics = [#tpu.dimension_semantics<parallel>], iteration_bounds = array<i64: 1>, scalar_prefetch = 0 : i64, scratch_operands = 0 : i64, tpu.core_type = #tpu.core_type<tc>, window_params = [{transform_indices = @transform_0, window_bounds = array<i64: 5, 5>}, {transform_indices = @transform_1, window_bounds = array<i64: 1, 5>}, {transform_indices = @transform_2, window_bounds = array<i64: 2, 5>}, {transform_indices = @transform_3, window_bounds = array<i64: 1, 2>}, {transform_indices = @transform_4, window_bounds = array<i64: 5, 8, 128>}, {transform_indices = @transform_5, window_bounds = array<i64: 2, 8, 128>}]} {
    %c0 = arith.constant 0 : index
    %c0_0 = arith.constant 0 : index
    %c0_1 = arith.constant 0 : index
    %0 = vector.load %arg5[%c0, %c0_0, %c0_1] : memref<5x8x128xf32, #tpu.memory_space<vmem>>, vector<1x8x128xf32>
    %1 = vector.shape_cast %0 : vector<1x8x128xf32> to vector<8x128xf32>
    %c1 = arith.constant 1 : index
    %c0_2 = arith.constant 0 : index
    %c0_3 = arith.constant 0 : index
    %2 = vector.load %arg5[%c1, %c0_2, %c0_3] : memref<5x8x128xf32, #tpu.memory_space<vmem>>, vector<1x8x128xf32>
    %3 = vector.shape_cast %2 : vector<1x8x128xf32> to vector<8x128xf32>
    %c2 = arith.constant 2 : index
    %c0_4 = arith.constant 0 : index
    %c0_5 = arith.constant 0 : index
    %4 = vector.load %arg5[%c2, %c0_4, %c0_5] : memref<5x8x128xf32, #tpu.memory_space<vmem>>, vector<1x8x128xf32>
    %5 = vector.shape_cast %4 : vector<1x8x128xf32> to vector<8x128xf32>
    %c3 = arith.constant 3 : index
    %c0_6 = arith.constant 0 : index
    %c0_7 = arith.constant 0 : index
    %6 = vector.load %arg5[%c3, %c0_6, %c0_7] : memref<5x8x128xf32, #tpu.memory_space<vmem>>, vector<1x8x128xf32>
    %7 = vector.shape_cast %6 : vector<1x8x128xf32> to vector<8x128xf32>
    %c4 = arith.constant 4 : index
    %c0_8 = arith.constant 0 : index
    %c0_9 = arith.constant 0 : index
    %8 = vector.load %arg5[%c4, %c0_8, %c0_9] : memref<5x8x128xf32, #tpu.memory_space<vmem>>, vector<1x8x128xf32>
    %9 = vector.shape_cast %8 : vector<1x8x128xf32> to vector<8x128xf32>
    %c0_10 = arith.constant 0 : index
    %c0_11 = arith.constant 0 : index
    %10 = memref.load %arg2[%c0_10, %c0_11] : memref<1x5xf32, #tpu.memory_space<smem>>
    %11 = vector.broadcast %10 : f32 to vector<8x128xf32>
    %c0_12 = arith.constant 0 : index
    %c0_13 = arith.constant 0 : index
    %12 = memref.load %arg1[%c0_12, %c0_13] : memref<5x5xf32, #tpu.memory_space<smem>>
    %13 = vector.broadcast %12 : f32 to vector<8x128xf32>
    %14 = arith.mulf %13, %1 : vector<8x128xf32>
    %15 = arith.addf %11, %14 : vector<8x128xf32>
    %c0_14 = arith.constant 0 : index
    %c1_15 = arith.constant 1 : index
    %16 = memref.load %arg1[%c0_14, %c1_15] : memref<5x5xf32, #tpu.memory_space<smem>>
    %17 = vector.broadcast %16 : f32 to vector<8x128xf32>
    %18 = arith.mulf %17, %3 : vector<8x128xf32>
    %19 = arith.addf %15, %18 : vector<8x128xf32>
    %c0_16 = arith.constant 0 : index
    %c2_17 = arith.constant 2 : index
    %20 = memref.load %arg1[%c0_16, %c2_17] : memref<5x5xf32, #tpu.memory_space<smem>>
    %21 = vector.broadcast %20 : f32 to vector<8x128xf32>
    %22 = arith.mulf %21, %5 : vector<8x128xf32>
    %23 = arith.addf %19, %22 : vector<8x128xf32>
    %c0_18 = arith.constant 0 : index
    %c3_19 = arith.constant 3 : index
    %24 = memref.load %arg1[%c0_18, %c3_19] : memref<5x5xf32, #tpu.memory_space<smem>>
    %25 = vector.broadcast %24 : f32 to vector<8x128xf32>
    %26 = arith.mulf %25, %7 : vector<8x128xf32>
    %27 = arith.addf %23, %26 : vector<8x128xf32>
    %c0_20 = arith.constant 0 : index
    %c4_21 = arith.constant 4 : index
    %28 = memref.load %arg1[%c0_20, %c4_21] : memref<5x5xf32, #tpu.memory_space<smem>>
    %29 = vector.broadcast %28 : f32 to vector<8x128xf32>
    %30 = arith.mulf %29, %9 : vector<8x128xf32>
    %31 = arith.addf %27, %30 : vector<8x128xf32>
    %32 = arith.negf %31 : vector<8x128xf32>
    %33 = math.exp %32 : vector<8x128xf32>
    %cst = arith.constant 1.000000e+00 : f32
    %34 = vector.broadcast %cst : f32 to vector<8x128xf32>
    %35 = arith.addf %34, %33 : vector<8x128xf32>
    %36 = arith.divf %34, %35 : vector<8x128xf32>
    %c0_22 = arith.constant 0 : index
    %c1_23 = arith.constant 1 : index
    %37 = memref.load %arg2[%c0_22, %c1_23] : memref<1x5xf32, #tpu.memory_space<smem>>
    %38 = vector.broadcast %37 : f32 to vector<8x128xf32>
    %c1_24 = arith.constant 1 : index
    %c0_25 = arith.constant 0 : index
    %39 = memref.load %arg1[%c1_24, %c0_25] : memref<5x5xf32, #tpu.memory_space<smem>>
    %40 = vector.broadcast %39 : f32 to vector<8x128xf32>
    %41 = arith.mulf %40, %1 : vector<8x128xf32>
    %42 = arith.addf %38, %41 : vector<8x128xf32>
    %c1_26 = arith.constant 1 : index
    %c1_27 = arith.constant 1 : index
    %43 = memref.load %arg1[%c1_26, %c1_27] : memref<5x5xf32, #tpu.memory_space<smem>>
    %44 = vector.broadcast %43 : f32 to vector<8x128xf32>
    %45 = arith.mulf %44, %3 : vector<8x128xf32>
    %46 = arith.addf %42, %45 : vector<8x128xf32>
    %c1_28 = arith.constant 1 : index
    %c2_29 = arith.constant 2 : index
    %47 = memref.load %arg1[%c1_28, %c2_29] : memref<5x5xf32, #tpu.memory_space<smem>>
    %48 = vector.broadcast %47 : f32 to vector<8x128xf32>
    %49 = arith.mulf %48, %5 : vector<8x128xf32>
    %50 = arith.addf %46, %49 : vector<8x128xf32>
    %c1_30 = arith.constant 1 : index
    %c3_31 = arith.constant 3 : index
    %51 = memref.load %arg1[%c1_30, %c3_31] : memref<5x5xf32, #tpu.memory_space<smem>>
    %52 = vector.broadcast %51 : f32 to vector<8x128xf32>
    %53 = arith.mulf %52, %7 : vector<8x128xf32>
    %54 = arith.addf %50, %53 : vector<8x128xf32>
    %c1_32 = arith.constant 1 : index
    %c4_33 = arith.constant 4 : index
    %55 = memref.load %arg1[%c1_32, %c4_33] : memref<5x5xf32, #tpu.memory_space<smem>>
    %56 = vector.broadcast %55 : f32 to vector<8x128xf32>
    %57 = arith.mulf %56, %9 : vector<8x128xf32>
    %58 = arith.addf %54, %57 : vector<8x128xf32>
    %59 = arith.negf %58 : vector<8x128xf32>
    %60 = math.exp %59 : vector<8x128xf32>
    %cst_34 = arith.constant 1.000000e+00 : f32
    %61 = vector.broadcast %cst_34 : f32 to vector<8x128xf32>
    %62 = arith.addf %61, %60 : vector<8x128xf32>
    %63 = arith.divf %61, %62 : vector<8x128xf32>
    %c0_35 = arith.constant 0 : index
    %c2_36 = arith.constant 2 : index
    %64 = memref.load %arg2[%c0_35, %c2_36] : memref<1x5xf32, #tpu.memory_space<smem>>
    %65 = vector.broadcast %64 : f32 to vector<8x128xf32>
    %c2_37 = arith.constant 2 : index
    %c0_38 = arith.constant 0 : index
    %66 = memref.load %arg1[%c2_37, %c0_38] : memref<5x5xf32, #tpu.memory_space<smem>>
    %67 = vector.broadcast %66 : f32 to vector<8x128xf32>
    %68 = arith.mulf %67, %1 : vector<8x128xf32>
    %69 = arith.addf %65, %68 : vector<8x128xf32>
    %c2_39 = arith.constant 2 : index
    %c1_40 = arith.constant 1 : index
    %70 = memref.load %arg1[%c2_39, %c1_40] : memref<5x5xf32, #tpu.memory_space<smem>>
    %71 = vector.broadcast %70 : f32 to vector<8x128xf32>
    %72 = arith.mulf %71, %3 : vector<8x128xf32>
    %73 = arith.addf %69, %72 : vector<8x128xf32>
    %c2_41 = arith.constant 2 : index
    %c2_42 = arith.constant 2 : index
    %74 = memref.load %arg1[%c2_41, %c2_42] : memref<5x5xf32, #tpu.memory_space<smem>>
    %75 = vector.broadcast %74 : f32 to vector<8x128xf32>
    %76 = arith.mulf %75, %5 : vector<8x128xf32>
    %77 = arith.addf %73, %76 : vector<8x128xf32>
    %c2_43 = arith.constant 2 : index
    %c3_44 = arith.constant 3 : index
    %78 = memref.load %arg1[%c2_43, %c3_44] : memref<5x5xf32, #tpu.memory_space<smem>>
    %79 = vector.broadcast %78 : f32 to vector<8x128xf32>
    %80 = arith.mulf %79, %7 : vector<8x128xf32>
    %81 = arith.addf %77, %80 : vector<8x128xf32>
    %c2_45 = arith.constant 2 : index
    %c4_46 = arith.constant 4 : index
    %82 = memref.load %arg1[%c2_45, %c4_46] : memref<5x5xf32, #tpu.memory_space<smem>>
    %83 = vector.broadcast %82 : f32 to vector<8x128xf32>
    %84 = arith.mulf %83, %9 : vector<8x128xf32>
    %85 = arith.addf %81, %84 : vector<8x128xf32>
    %86 = arith.negf %85 : vector<8x128xf32>
    %87 = math.exp %86 : vector<8x128xf32>
    %cst_47 = arith.constant 1.000000e+00 : f32
    %88 = vector.broadcast %cst_47 : f32 to vector<8x128xf32>
    %89 = arith.addf %88, %87 : vector<8x128xf32>
    %90 = arith.divf %88, %89 : vector<8x128xf32>
    %c0_48 = arith.constant 0 : index
    %c3_49 = arith.constant 3 : index
    %91 = memref.load %arg2[%c0_48, %c3_49] : memref<1x5xf32, #tpu.memory_space<smem>>
    %92 = vector.broadcast %91 : f32 to vector<8x128xf32>
    %c3_50 = arith.constant 3 : index
    %c0_51 = arith.constant 0 : index
    %93 = memref.load %arg1[%c3_50, %c0_51] : memref<5x5xf32, #tpu.memory_space<smem>>
    %94 = vector.broadcast %93 : f32 to vector<8x128xf32>
    %95 = arith.mulf %94, %1 : vector<8x128xf32>
    %96 = arith.addf %92, %95 : vector<8x128xf32>
    %c3_52 = arith.constant 3 : index
    %c1_53 = arith.constant 1 : index
    %97 = memref.load %arg1[%c3_52, %c1_53] : memref<5x5xf32, #tpu.memory_space<smem>>
    %98 = vector.broadcast %97 : f32 to vector<8x128xf32>
    %99 = arith.mulf %98, %3 : vector<8x128xf32>
    %100 = arith.addf %96, %99 : vector<8x128xf32>
    %c3_54 = arith.constant 3 : index
    %c2_55 = arith.constant 2 : index
    %101 = memref.load %arg1[%c3_54, %c2_55] : memref<5x5xf32, #tpu.memory_space<smem>>
    %102 = vector.broadcast %101 : f32 to vector<8x128xf32>
    %103 = arith.mulf %102, %5 : vector<8x128xf32>
    %104 = arith.addf %100, %103 : vector<8x128xf32>
    %c3_56 = arith.constant 3 : index
    %c3_57 = arith.constant 3 : index
    %105 = memref.load %arg1[%c3_56, %c3_57] : memref<5x5xf32, #tpu.memory_space<smem>>
    %106 = vector.broadcast %105 : f32 to vector<8x128xf32>
    %107 = arith.mulf %106, %7 : vector<8x128xf32>
    %108 = arith.addf %104, %107 : vector<8x128xf32>
    %c3_58 = arith.constant 3 : index
    %c4_59 = arith.constant 4 : index
    %109 = memref.load %arg1[%c3_58, %c4_59] : memref<5x5xf32, #tpu.memory_space<smem>>
    %110 = vector.broadcast %109 : f32 to vector<8x128xf32>
    %111 = arith.mulf %110, %9 : vector<8x128xf32>
    %112 = arith.addf %108, %111 : vector<8x128xf32>
    %113 = arith.negf %112 : vector<8x128xf32>
    %114 = math.exp %113 : vector<8x128xf32>
    %cst_60 = arith.constant 1.000000e+00 : f32
    %115 = vector.broadcast %cst_60 : f32 to vector<8x128xf32>
    %116 = arith.addf %115, %114 : vector<8x128xf32>
    %117 = arith.divf %115, %116 : vector<8x128xf32>
    %c0_61 = arith.constant 0 : index
    %c4_62 = arith.constant 4 : index
    %118 = memref.load %arg2[%c0_61, %c4_62] : memref<1x5xf32, #tpu.memory_space<smem>>
    %119 = vector.broadcast %118 : f32 to vector<8x128xf32>
    %c4_63 = arith.constant 4 : index
    %c0_64 = arith.constant 0 : index
    %120 = memref.load %arg1[%c4_63, %c0_64] : memref<5x5xf32, #tpu.memory_space<smem>>
    %121 = vector.broadcast %120 : f32 to vector<8x128xf32>
    %122 = arith.mulf %121, %1 : vector<8x128xf32>
    %123 = arith.addf %119, %122 : vector<8x128xf32>
    %c4_65 = arith.constant 4 : index
    %c1_66 = arith.constant 1 : index
    %124 = memref.load %arg1[%c4_65, %c1_66] : memref<5x5xf32, #tpu.memory_space<smem>>
    %125 = vector.broadcast %124 : f32 to vector<8x128xf32>
    %126 = arith.mulf %125, %3 : vector<8x128xf32>
    %127 = arith.addf %123, %126 : vector<8x128xf32>
    %c4_67 = arith.constant 4 : index
    %c2_68 = arith.constant 2 : index
    %128 = memref.load %arg1[%c4_67, %c2_68] : memref<5x5xf32, #tpu.memory_space<smem>>
    %129 = vector.broadcast %128 : f32 to vector<8x128xf32>
    %130 = arith.mulf %129, %5 : vector<8x128xf32>
    %131 = arith.addf %127, %130 : vector<8x128xf32>
    %c4_69 = arith.constant 4 : index
    %c3_70 = arith.constant 3 : index
    %132 = memref.load %arg1[%c4_69, %c3_70] : memref<5x5xf32, #tpu.memory_space<smem>>
    %133 = vector.broadcast %132 : f32 to vector<8x128xf32>
    %134 = arith.mulf %133, %7 : vector<8x128xf32>
    %135 = arith.addf %131, %134 : vector<8x128xf32>
    %c4_71 = arith.constant 4 : index
    %c4_72 = arith.constant 4 : index
    %136 = memref.load %arg1[%c4_71, %c4_72] : memref<5x5xf32, #tpu.memory_space<smem>>
    %137 = vector.broadcast %136 : f32 to vector<8x128xf32>
    %138 = arith.mulf %137, %9 : vector<8x128xf32>
    %139 = arith.addf %135, %138 : vector<8x128xf32>
    %140 = arith.negf %139 : vector<8x128xf32>
    %141 = math.exp %140 : vector<8x128xf32>
    %cst_73 = arith.constant 1.000000e+00 : f32
    %142 = vector.broadcast %cst_73 : f32 to vector<8x128xf32>
    %143 = arith.addf %142, %141 : vector<8x128xf32>
    %144 = arith.divf %142, %143 : vector<8x128xf32>
    %c0_74 = arith.constant 0 : index
    %c0_75 = arith.constant 0 : index
    %145 = memref.load %arg4[%c0_74, %c0_75] : memref<1x2xf32, #tpu.memory_space<smem>>
    %146 = vector.broadcast %145 : f32 to vector<8x128xf32>
    %c0_76 = arith.constant 0 : index
    %c0_77 = arith.constant 0 : index
    %147 = memref.load %arg3[%c0_76, %c0_77] : memref<2x5xf32, #tpu.memory_space<smem>>
    %148 = vector.broadcast %147 : f32 to vector<8x128xf32>
    %149 = arith.mulf %148, %36 : vector<8x128xf32>
    %150 = arith.addf %146, %149 : vector<8x128xf32>
    %c0_78 = arith.constant 0 : index
    %c1_79 = arith.constant 1 : index
    %151 = memref.load %arg3[%c0_78, %c1_79] : memref<2x5xf32, #tpu.memory_space<smem>>
    %152 = vector.broadcast %151 : f32 to vector<8x128xf32>
    %153 = arith.mulf %152, %63 : vector<8x128xf32>
    %154 = arith.addf %150, %153 : vector<8x128xf32>
    %c0_80 = arith.constant 0 : index
    %c2_81 = arith.constant 2 : index
    %155 = memref.load %arg3[%c0_80, %c2_81] : memref<2x5xf32, #tpu.memory_space<smem>>
    %156 = vector.broadcast %155 : f32 to vector<8x128xf32>
    %157 = arith.mulf %156, %90 : vector<8x128xf32>
    %158 = arith.addf %154, %157 : vector<8x128xf32>
    %c0_82 = arith.constant 0 : index
    %c3_83 = arith.constant 3 : index
    %159 = memref.load %arg3[%c0_82, %c3_83] : memref<2x5xf32, #tpu.memory_space<smem>>
    %160 = vector.broadcast %159 : f32 to vector<8x128xf32>
    %161 = arith.mulf %160, %117 : vector<8x128xf32>
    %162 = arith.addf %158, %161 : vector<8x128xf32>
    %c0_84 = arith.constant 0 : index
    %c4_85 = arith.constant 4 : index
    %163 = memref.load %arg3[%c0_84, %c4_85] : memref<2x5xf32, #tpu.memory_space<smem>>
    %164 = vector.broadcast %163 : f32 to vector<8x128xf32>
    %165 = arith.mulf %164, %144 : vector<8x128xf32>
    %166 = arith.addf %162, %165 : vector<8x128xf32>
    %c0_86 = arith.constant 0 : index
    %c0_87 = arith.constant 0 : index
    %c0_88 = arith.constant 0 : index
    %167 = vector.load %arg6[%c0_86, %c0_87, %c0_88] : memref<2x8x128xf32, #tpu.memory_space<vmem>>, vector<1x8x128xf32>
    %168 = vector.shape_cast %167 : vector<1x8x128xf32> to vector<8x128xf32>
    %169 = vector.shape_cast %166 : vector<8x128xf32> to vector<1x8x128xf32>
    tpu.vector_store %arg6[%c0_86, %c0_87, %c0_88], %169 {strides = array<i32>} : memref<2x8x128xf32, #tpu.memory_space<vmem>>, vector<1x8x128xf32>,
    %c0_89 = arith.constant 0 : index
    %c1_90 = arith.constant 1 : index
    %170 = memref.load %arg4[%c0_89, %c1_90] : memref<1x2xf32, #tpu.memory_space<smem>>
    %171 = vector.broadcast %170 : f32 to vector<8x128xf32>
    %c1_91 = arith.constant 1 : index
    %c0_92 = arith.constant 0 : index
    %172 = memref.load %arg3[%c1_91, %c0_92] : memref<2x5xf32, #tpu.memory_space<smem>>
    %173 = vector.broadcast %172 : f32 to vector<8x128xf32>
    %174 = arith.mulf %173, %36 : vector<8x128xf32>
    %175 = arith.addf %171, %174 : vector<8x128xf32>
    %c1_93 = arith.constant 1 : index
    %c1_94 = arith.constant 1 : index
    %176 = memref.load %arg3[%c1_93, %c1_94] : memref<2x5xf32, #tpu.memory_space<smem>>
    %177 = vector.broadcast %176 : f32 to vector<8x128xf32>
    %178 = arith.mulf %177, %63 : vector<8x128xf32>
    %179 = arith.addf %175, %178 : vector<8x128xf32>
    %c1_95 = arith.constant 1 : index
    %c2_96 = arith.constant 2 : index
    %180 = memref.load %arg3[%c1_95, %c2_96] : memref<2x5xf32, #tpu.memory_space<smem>>
    %181 = vector.broadcast %180 : f32 to vector<8x128xf32>
    %182 = arith.mulf %181, %90 : vector<8x128xf32>
    %183 = arith.addf %179, %182 : vector<8x128xf32>
    %c1_97 = arith.constant 1 : index
    %c3_98 = arith.constant 3 : index
    %184 = memref.load %arg3[%c1_97, %c3_98] : memref<2x5xf32, #tpu.memory_space<smem>>
    %185 = vector.broadcast %184 : f32 to vector<8x128xf32>
    %186 = arith.mulf %185, %117 : vector<8x128xf32>
    %187 = arith.addf %183, %186 : vector<8x128xf32>
    %c1_99 = arith.constant 1 : index
    %c4_100 = arith.constant 4 : index
    %188 = memref.load %arg3[%c1_99, %c4_100] : memref<2x5xf32, #tpu.memory_space<smem>>
    %189 = vector.broadcast %188 : f32 to vector<8x128xf32>
    %190 = arith.mulf %189, %144 : vector<8x128xf32>
    %191 = arith.addf %187, %190 : vector<8x128xf32>
    %c1_101 = arith.constant 1 : index
    %c0_102 = arith.constant 0 : index
    %c0_103 = arith.constant 0 : index
    %192 = vector.load %arg6[%c1_101, %c0_102, %c0_103] : memref<2x8x128xf32, #tpu.memory_space<vmem>>, vector<1x8x128xf32>
    %193 = vector.shape_cast %192 : vector<1x8x128xf32> to vector<8x128xf32>
    %194 = vector.shape_cast %191 : vector<8x128xf32> to vector<1x8x128xf32>
    tpu.vector_store %arg6[%c1_101, %c0_102, %c0_103], %194 {strides = array<i32>} : memref<2x8x128xf32, #tpu.memory_space<vmem>>, vector<1x8x128xf32>,
    return
  }
  func.func @transform_0(%arg0: i32) -> (i32, i32) {
    %c0_i32 = arith.constant 0 : i32
    %c0_i32_0 = arith.constant 0 : i32
    %c0_i32_1 = arith.constant 0 : i32
    return %c0_i32, %c0_i32_0 : i32, i32
  }
  func.func @transform_1(%arg0: i32) -> (i32, i32) {
    %c0_i32 = arith.constant 0 : i32
    %c0_i32_0 = arith.constant 0 : i32
    %c0_i32_1 = arith.constant 0 : i32
    return %c0_i32, %c0_i32_0 : i32, i32
  }
  func.func @transform_2(%arg0: i32) -> (i32, i32) {
    %c0_i32 = arith.constant 0 : i32
    %c0_i32_0 = arith.constant 0 : i32
    %c0_i32_1 = arith.constant 0 : i32
    return %c0_i32, %c0_i32_0 : i32, i32
  }
  func.func @transform_3(%arg0: i32) -> (i32, i32) {
    %c0_i32 = arith.constant 0 : i32
    %c0_i32_0 = arith.constant 0 : i32
    %c0_i32_1 = arith.constant 0 : i32
    return %c0_i32, %c0_i32_0 : i32, i32
  }
  func.func @transform_4(%arg0: i32) -> (i32, i32, i32) {
    %c0_i32 = arith.constant 0 : i32
    %c0_i32_0 = arith.constant 0 : i32
    %c0_i32_1 = arith.constant 0 : i32
    return %c0_i32, %arg0, %c0_i32_0 : i32, i32, i32
  }
  func.func @transform_5(%arg0: i32) -> (i32, i32, i32) {
    %c0_i32 = arith.constant 0 : i32
    %c0_i32_0 = arith.constant 0 : i32
    %c0_i32_1 = arith.constant 0 : i32
    return %c0_i32, %arg0, %c0_i32_0 : i32, i32, i32
  }
}

</mosaic_0001>

<bundles_post_ra>
// kernel: tpu_custom_call.1
= control target key start
LH: loop header
LB: loop body
LE: loop exit
PB: predicated region body
PF: predicated region fallthrough
CT: control target
= control target key end

     0   :  { %10 = vsyncpa [#allocation5], 0  ;;  %s670_s0 = inlined_call_operand.hbm [shape: f32[5,5], index: 0, kind: input, shape index: {}]   ;;  %s671_s1 = inlined_call_operand.vmem [shape: f32[1,5], index: 1, kind: input, shape index: {}]   ;;  %s672_s2 = inlined_call_operand.vmem [shape: f32[2,5], index: 2, kind: input, shape index: {}]   ;;  %s673_s3 = inlined_call_operand.vmem [shape: f32[1,2], index: 3, kind: input, shape index: {}]   ;;  %s674_s4 = inlined_call_operand.hbm [shape: f32[5,8,128], index: 4, kind: input, shape index: {}]   ;;  %s675_s5 = inlined_call_operand.hbm [shape: f32[2,8,128], index: 5, kind: output, shape index: {}]  }
   0x1   :  { %11 = vsyncpa [#allocation6], 0 }
   0x2   :  { %12 = vsyncpa [#allocation9], 0 }
   0x3   :  { %13 = vsyncpa [#allocation3], 0  ;;  %s39_s20 = sshll.u32 %s672_s2, 4  ;;  %s40_s20 = int_to_ptr.vmem [resolvable:$true] %s39_s20 }
   0x4   :  { %14 = vsyncpa [#allocation4], 0  ;;  %s368_s21 = scalar_lea.vmem %s40_s20, 32  ;;  %p373_p1 = scmp.lt.s32.totalorder %s40_s20, %s40_s20 }
   0x5   :  { %p369_p0 = scmp.ne.s32.totalorder %s40_s20, %s368_s21  ;;  %p374_p2 = scmp.lt.s32.totalorder %s368_s21, %s368_s21 }
   0x7   :  { %p375_p3 = por %p374_p2, %p373_p1 }
   0x9   :  { %p376_p4 = pnand %p375_p3, %p369_p0 }
   0xb   :  { %379 = shalt.err (!%p376_p4)
}
   0xc   :  { %s468_s22 = smov [#allocation8]   ;;  %s380_s25 = scalar_lea.hbm %s670_s0, 128 }
   0xd   :  { %42 = dma.vmem_to_smem %s40_s20, 32, %s468_s22, [#allocation9]  }
   0xe   :  { %p381_p5 = scmp.ne.s32.totalorder %s670_s0, %s380_s25  ;;  %p384_p6 = scmp.lt.u32.totalorder %s380_s25, %s670_s0 }
  0x10   :  { %p386_p7 = pnand %p384_p6, %p381_p5 }
  0x12   :  { %389 = shalt.err (!%p386_p7)
}
  0x13   :  { %s469_s29 = smov [#allocation2]   ;;  %s29_s9 = sshll.u32 %s671_s1, 4  ;;  %s30_s9 = int_to_ptr.vmem [resolvable:$true] %s29_s9 }
  0x14   :  { %22 = dma.hbm_to_smem %s670_s0, 128, %s469_s29, [#allocation5]  }
  0x15   :  { %s49_s12 = sshll.u32 %s673_s3, 4  ;;  %s390_s13 = scalar_lea.vmem %s30_s9, 16  ;;  %s50_s12 = int_to_ptr.vmem [resolvable:$true] %s49_s12 }
  0x16   :  { %p391_p8 = scmp.ne.s32.totalorder %s30_s9, %s390_s13  ;;  %p395_p9 = scmp.lt.s32.totalorder %s30_s9, %s30_s9 }
  0x17   :  { %p396_p10 = scmp.lt.s32.totalorder %s390_s13, %s390_s13 }
  0x19   :  { %p397_p11 = por %p396_p10, %p395_p9 }
  0x1b   :  { %p398_p12 = pnand %p397_p11, %p391_p8 }
  0x1d   :  { %401 = shalt.err (!%p398_p12)
}
  0x1e   :  { %s470_s14 = smov [#allocation7]   ;;  %s402_s0 = scalar_lea.vmem %s50_s12, 16 }
  0x1f   :  { %32 = dma.vmem_to_smem %s30_s9, 16, %s470_s14, [#allocation6]  }
  0x20   :  { %p403_p13 = scmp.ne.s32.totalorder %s50_s12, %s402_s0  ;;  %p407_p0 = scmp.lt.s32.totalorder %s50_s12, %s50_s12 }
  0x21   :  { %p408_p1 = scmp.lt.s32.totalorder %s402_s0, %s402_s0 }
  0x23   :  { %p409_p2 = por %p408_p1, %p407_p0 }
  0x25   :  { %p410_p3 = pnand %p409_p2, %p403_p13 }
  0x27   :  { %413 = shalt.err (!%p410_p3)
}
  0x28   :  { %s471_s1 = smov [#allocation10]   ;;  %s472_s3 = smov [#allocation11]  }
  0x29   :  { %52 = dma.vmem_to_smem %s50_s12, 16, %s471_s1, [#allocation9]  }
  0x2a   :  { %s58_s15 = sshll.u32 %s472_s3, 4  ;;  %s414_s18 = scalar_lea.hbm %s674_s4, 640  ;;  %s59_s15 = int_to_ptr.vmem [resolvable:$true] %s58_s15 }
  0x2b   :  { %p415_p4 = scmp.ne.s32.totalorder %s674_s4, %s414_s18  ;;  %p418_p5 = scmp.lt.u32.totalorder %s414_s18, %s674_s4 }
  0x2d   :  { %p420_p6 = pnand %p418_p5, %p415_p4 }
  0x2f   :  { %423 = shalt.err (!%p420_p6)
}
  0x30   :  { %s424_s23 = scalar_lea.vmem %s59_s15, 640  ;;  %p429_p8 = scmp.lt.s32.totalorder %s59_s15, %s59_s15 }
  0x31   :  { %p425_p7 = scmp.ne.s32.totalorder %s59_s15, %s424_s23  ;;  %p430_p9 = scmp.lt.s32.totalorder %s424_s23, %s424_s23 }
  0x33   :  { %p431_p10 = por %p430_p9, %p429_p8 }
  0x35   :  { %p432_p11 = pnand %p431_p10, %p425_p7 }
  0x37   :  { %435 = shalt.err (!%p432_p11)
}
  0x38   :  { %s473_s24 = smov 128   ;;  %s474_s25 = smov 8  }
  0x39   :  { %64 = dma.hbm_to_vmem [thread:$0]  %s674_s4, 640, %s59_s15, [#allocation3], %s473_s24, %s473_s24, %s474_s25  }
  0x3a   :  { %458 = dma.done.wait [#allocation5], 128  }
  0x3b   :  { %459 = vsyncadd [#allocation5], 4294967168 }
  0x3c   :  { %460 = dma.done.wait [#allocation6], 16  }
  0x3d   :  { %461 = vsyncadd [#allocation6], 4294967280 }
  0x3e   :  { %462 = dma.done.wait [#allocation9], 48  }
  0x3f   :  { %463 = vsyncadd [#allocation9], 4294967248 }
  0x40   :  { %464 = dma.done.wait [#allocation3], 640  }
  0x41   :  { %465 = vsyncadd [#allocation3], 4294966656 }
  0x42   :  { %80 = sfence }
  0x43   :  { %s542_s2 = sld [smem:[#allocation7]]  ;;  %s297_s29 = sld [smem:[#allocation2 + $0x1]]  ;;  %v552_v0 = vld [vmem:[#allocation11] sm:$0xff]  ;;  %v554_v1 = vld [vmem:[#allocation11 + $0x8] sm:$0xff]  ;;  %v560_v2 = vld [vmem:[#allocation11 + $0x10] sm:$0xff] }
  0x44   :  { %s92_s28 = sld [smem:[#allocation2]]  ;;  %s298_s30 = sld [smem:[#allocation2 + $0x2]]  ;;  %v562_v3 = vld [vmem:[#allocation11 + $0x18] sm:$0xff]  ;;  %v568_v4 = vld [vmem:[#allocation11 + $0x20] sm:$0xff] }
  0x45   :  { %s299_s6 = sld [smem:[#allocation2 + $0x3]]  ;;  %s544_s7 = sld [smem:[#allocation2 + $0x4]] }
  0x46   :  { %s546_s8 = sld [smem:[#allocation7 + $0x1]]  ;;  %s548_s4 = sld [smem:[#allocation2 + $0x80]] }
  0x47   :  { %s550_s9 = sld [smem:[#allocation2 + $0x81]]  ;;  %s556_s10 = sld [smem:[#allocation2 + $0x82]] }
  0x48   :  { %s558_s11 = sld [smem:[#allocation2 + $0x83]]  ;;  %s564_s12 = sld [smem:[#allocation2 + $0x84]] }
  0x49   :  { %s566_s13 = sld [smem:[#allocation7 + $0x2]]  ;;  %v91_v5 = vstv %s542_s2  ;;  %v97_v7 = vstv %s297_s29  ;;  %s571_s14 = sld [smem:[#allocation2 + $0x100]] }
  0x4a   :  { %v93_v6 = vstv %s92_s28  ;;  %s573_s0 = sld [smem:[#allocation2 + $0x101]]  ;;  %v98_v9 = vmul.f32 %v97_v7, %v554_v1  ;;  %v101_v10 = vstv %s298_s30  ;;  %s577_s1 = sld [smem:[#allocation2 + $0x102]] }
  0x4b   :  { %v94_v8 = vmul.f32 %v93_v6, %v552_v0  ;;  %v105_v11 = vstv %s299_s6  ;;  %s579_s3 = sld [smem:[#allocation2 + $0x103]]  ;;  %v102_v12 = vmul.f32 %v101_v10, %v560_v2  ;;  %v109_v14 = vstv %s544_s7  ;;  %s585_s15 = sld [smem:[#allocation2 + $0x104]] }
  0x4c   :  { %v106_v13 = vmul.f32 %v105_v11, %v562_v3  ;;  %v119_v15 = vstv %s546_s8  ;;  %s587_s16 = sld [smem:[#allocation7 + $0x3]]  ;;  %v110_v17 = vmul.f32 %v109_v14, %v568_v4  ;;  %v121_v18 = vstv %s548_s4  ;;  %s592_s17 = sld [smem:[#allocation2 + $0x180]] }
  0x4d   :  { %v95_v16 = vadd.f32 %v94_v8, %v91_v5  ;;  %v125_v19 = vstv %s550_s9  ;;  %s594_s18 = sld [smem:[#allocation2 + $0x181]]  ;;  %v122_v20 = vmul.f32 %v121_v18, %v552_v0  ;;  %v129_v22 = vstv %s556_s10  ;;  %s600_s19 = sld [smem:[#allocation2 + $0x182]] }
  0x4e   :  { %v126_v21 = vmul.f32 %v125_v19, %v554_v1  ;;  %v133_v23 = vstv %s558_s11  ;;  %s602_s20 = sld [smem:[#allocation2 + $0x183]]  ;;  %v130_v25 = vmul.f32 %v129_v22, %v560_v2  ;;  %v137_v27 = vstv %s564_s12  ;;  %s610_s21 = sld [smem:[#allocation2 + $0x184]] }
  0x4f   :  { %v99_v24 = vadd.f32 %v98_v9, %v95_v16  ;;  %v134_v26 = vmul.f32 %v133_v23, %v562_v3  ;;  %v123_v28 = vadd.f32 %v122_v20, %v119_v15  ;;  %v138_v29 = vmul.f32 %v137_v27, %v568_v4  ;;  %s612_s22 = sld [smem:[#allocation7 + $0x4]]  ;;  %s617_s23 = sld [smem:[#allocation2 + $0x200]] }
  0x50   :  { %v147_v30 = vstv %s566_s13  ;;  %v149_v31 = vstv %s571_s14  ;;  %v153_v34 = vstv %s573_s0  ;;  %v157_v35 = vstv %s577_s1  ;;  %s622_s26 = sld [smem:[#allocation2 + $0x201]]  ;;  %s624_s27 = sld [smem:[#allocation2 + $0x202]] }
  0x51   :  { %v103_v32 = vadd.f32 %v102_v12, %v99_v24  ;;  %v150_v33 = vmul.f32 %v149_v31, %v552_v0  ;;  %v127_v36 = vadd.f32 %v126_v21, %v123_v28  ;;  %v154_v37 = vmul.f32 %v153_v34, %v554_v1  ;;  %s631_s2 = sld [smem:[#allocation2 + $0x203]]  ;;  %s638_s28 = sld [smem:[#allocation2 + $0x204]] }
  0x52   :  { %v158_v38 = vmul.f32 %v157_v35, %v560_v2  ;;  %v161_v39 = vstv %s579_s3  ;;  %v165_v43 = vstv %s585_s15  ;;  %v175_v46 = vstv %s587_s16  ;;  %s232_s29 = sld [smem:[#allocation8]]  ;;  %s330_s7 = sld [smem:[#allocation8 + $0x1]] }
  0x53   :  { %v107_v40 = vadd.f32 %v106_v13, %v103_v32  ;;  %v151_v41 = vadd.f32 %v150_v33, %v147_v30  ;;  %v162_v42 = vmul.f32 %v161_v39, %v562_v3  ;;  %v131_v44 = vadd.f32 %v130_v25, %v127_v36  ;;  %s335_s30 = sld [smem:[#allocation8 + $0x80]]  ;;  %s334_s8 = sld [smem:[#allocation10 + $0x1]] }
  0x54   :  { %v166_v45 = vmul.f32 %v165_v43, %v568_v4  ;;  %v177_v47 = vstv %s592_s17  ;;  %v181_v51 = vstv %s594_s18  ;;  %v185_v54 = vstv %s600_s19  ;;  %s230_s6 = sld [smem:[#allocation10]]  ;;  %s336_s4 = sld [smem:[#allocation8 + $0x81]] }
  0x55   :  { %v111_v48 = vadd.f32 %v110_v17, %v107_v40  ;;  %v155_v49 = vadd.f32 %v154_v37, %v151_v41  ;;  %v178_v50 = vmul.f32 %v177_v47, %v552_v0  ;;  %v135_v52 = vadd.f32 %v134_v26, %v131_v44  ;;  %s331_s9 = sld [smem:[#allocation8 + $0x2]]  ;;  %s332_s11 = sld [smem:[#allocation8 + $0x3]] }
  0x56   :  { %v182_v53 = vmul.f32 %v181_v51, %v554_v1  ;;  %v189_v55 = vstv %s602_s20  ;;  %v186_v59 = vmul.f32 %v185_v54, %v560_v2  ;;  %v193_v62 = vstv %s610_s21  ;;  %s337_s10 = sld [smem:[#allocation8 + $0x82]]  ;;  %s338_s12 = sld [smem:[#allocation8 + $0x83]] }
  0x57   :  { %v301_v56 = vmul.f32 -1.442695, %v111_v48  ;;  %v159_v57 = vadd.f32 %v158_v38, %v155_v49  ;;  %v179_v58 = vadd.f32 %v178_v50, %v175_v46  ;;  %v139_v60 = vadd.f32 %v138_v29, %v135_v52  ;;  %s333_s13 = sld [smem:[#allocation8 + $0x4]]  ;;  %s475_s0 = smov [#allocation12]  }
  0x58   :  { %v190_v61 = vmul.f32 %v189_v55, %v562_v3  ;;  %v203_v63 = vstv %s612_s22  ;;  %v194_v7 = vmul.f32 %v193_v62, %v568_v4  ;;  %v205_v9 = vstv %s617_s23  ;;  %s339_s14 = sld [smem:[#allocation8 + $0x84]]  ;;  %s282_s1 = sshll.u32 %s475_s0, 4  ;;  %s283_s1 = int_to_ptr.vmem [resolvable:$true] %s282_s1 }
  0x59   :  { %348 = vpow2.f32 %v301_v56  ;;  %v163_v5 = vadd.f32 %v162_v42, %v159_v57  ;;  %v183_v6 = vadd.f32 %v182_v53, %v179_v58  ;;  %v308_v8 = vmul.f32 -1.442695, %v139_v60  ;;  %s436_s3 = scalar_lea.vmem %s283_s1, 256  ;;  %p441_p13 = scmp.lt.s32.totalorder %s283_s1, %s283_s1 }
  0x5a   :  { %v209_v10 = vstv %s622_s26  ;;  %v213_v11 = vstv %s624_s27  ;;  %v206_v14 = vmul.f32 %v205_v9, %v552_v0  ;;  %v217_v16 = vstv %s631_s2  ;;  %p437_p12 = scmp.ne.s32.totalorder %s283_s1, %s436_s3  ;;  %p442_p0 = scmp.lt.s32.totalorder %s436_s3, %s436_s3 }
  0x5b   :  { %v167_v12 = vadd.f32 %v166_v45, %v163_v5  ;;  %v187_v13 = vadd.f32 %v186_v59, %v183_v6  ;;  %v210_v15 = vmul.f32 %v209_v10, %v554_v1  ;;  %350 = vpow2.f32 %v308_v8 }
  0x5c   :  { %v207_v19 = vadd.f32 %v206_v14, %v203_v63  ;;  %v214_v20 = vmul.f32 %v213_v11, %v560_v2  ;;  %v221_v21 = vstv %s638_s28  ;;  %v218_v24 = vmul.f32 %v217_v16, %v562_v3  ;;  %p443_p1 = por %p442_p0, %p441_p13 }
  0x5d   :  { %v315_v17 = vmul.f32 -1.442695, %v167_v12  ;;  %v191_v18 = vadd.f32 %v190_v61, %v187_v13  ;;  %v222_v27 = vmul.f32 %v221_v21, %v568_v4  ;;  %v233_v34 = vstv %s232_s29 }
  0x5e   :  { %v211_v23 = vadd.f32 %v210_v15, %v207_v19  ;;  %v256_v35 = vstv %s335_s30  ;;  %v231_v37 = vstv %s230_s6  ;;  %v237_v38 = vstv %s330_s7  ;;  %p444_p2 = pnand %p443_p1, %p437_p12 }
  0x5f   :  { %352 = vpow2.f32 %v315_v17  ;;  %v195_v22 = vadd.f32 %v194_v7, %v191_v18  ;;  %v254_v40 = vstv %s334_s8  ;;  %v260_v42 = vstv %s336_s4 }
  0x60   :  { %v215_v26 = vadd.f32 %v214_v20, %v211_v23  ;;  %v241_v50 = vstv %s331_s9  ;;  %v264_v51 = vstv %s337_s10  ;;  %v245_v57 = vstv %s332_s11 }
  0x61   :  { %v322_v25 = vmul.f32 -1.442695, %v195_v22  ;;  %v268_v58 = vstv %s338_s12  ;;  %v249_v5 = vstv %s333_s13  ;;  %v272_v6 = vstv %s339_s14 }
  0x62   :  { %v219_v1 = vadd.f32 %v218_v24, %v215_v26 }
  0x63   :  { %v349_v0 = vpop.eup %348  ;;  %354 = vpow2.f32 %v322_v25 }
  0x64   :  { %v115_v28 = vadd.f32 1.0, %v349_v0  ;;  %v223_v29 = vadd.f32 %v222_v27, %v219_v1 }
  0x65   :  { %v351_v30 = vpop.eup %350 }
  0x66   :  { %356 = vrcp.f32 %v115_v28  ;;  %v143_v2 = vadd.f32 1.0, %v351_v30  ;;  %v329_v31 = vmul.f32 -1.442695, %v223_v29 }
  0x68   :  { %358 = vrcp.f32 %v143_v2 }
  0x69   :  { %v353_v32 = vpop.eup %352  ;;  %360 = vpow2.f32 %v329_v31 }
  0x6a   :  { %v171_v3 = vadd.f32 1.0, %v353_v32 }
  0x6c   :  { %362 = vrcp.f32 %v171_v3 }
  0x6d   :  { %v355_v4 = vpop.eup %354 }
  0x6e   :  { %v199_v33 = vadd.f32 1.0, %v355_v4 }
  0x70   :  { %v357_v36 = vpop.eup %356  ;;  %364 = vrcp.f32 %v199_v33 }
  0x71   :  { %v234_v39 = vmul.f32 %v357_v36, %v233_v34  ;;  %v257_v41 = vmul.f32 %v357_v36, %v256_v35 }
  0x72   :  { %v359_v43 = vpop.eup %358 }
  0x73   :  { %v361_v44 = vpop.eup %360  ;;  %v235_v45 = vadd.f32 %v234_v39, %v231_v37  ;;  %v238_v46 = vmul.f32 %v359_v43, %v237_v38  ;;  %v258_v47 = vadd.f32 %v257_v41, %v254_v40  ;;  %v261_v48 = vmul.f32 %v359_v43, %v260_v42 }
  0x74   :  { %v227_v49 = vadd.f32 1.0, %v361_v44 }
  0x75   :  { %v239_v53 = vadd.f32 %v238_v46, %v235_v45  ;;  %v262_v55 = vadd.f32 %v261_v48, %v258_v47 }
  0x76   :  { %v363_v52 = vpop.eup %362  ;;  %366 = vrcp.f32 %v227_v49 }
  0x77   :  { %v242_v54 = vmul.f32 %v363_v52, %v241_v50  ;;  %v265_v56 = vmul.f32 %v363_v52, %v264_v51 }
  0x79   :  { %v243_v60 = vadd.f32 %v242_v54, %v239_v53  ;;  %v266_v62 = vadd.f32 %v265_v56, %v262_v55 }
  0x7a   :  { %v365_v59 = vpop.eup %364 }
  0x7b   :  { %v246_v61 = vmul.f32 %v365_v59, %v245_v57  ;;  %v269_v63 = vmul.f32 %v365_v59, %v268_v58 }
  0x7d   :  { %v247_v7 = vadd.f32 %v246_v61, %v243_v60  ;;  %v270_v8 = vadd.f32 %v269_v63, %v266_v62 }
  0x80   :  { %v367_v9 = vpop.eup %366 }
  0x81   :  { %v250_v10 = vmul.f32 %v367_v9, %v249_v5  ;;  %v273_v11 = vmul.f32 %v367_v9, %v272_v6 }
  0x83   :  { %v251_v12 = vadd.f32 %v250_v10, %v247_v7  ;;  %v274_v13 = vadd.f32 %v273_v11, %v270_v8 }
  0x85   :  { %252 = vst [vmem:[#allocation12] sm:$0xff] %v251_v12  ;;  %276 = vst [vmem:[#allocation12 + $0x8] sm:$0xff] %v274_v13 }
  0x86   :  { %447 = shalt.err (!%p444_p2)
}
  0x87   :  { %s448_s17 = scalar_lea.hbm %s675_s5, 256 }
  0x88   :  { %p449_p3 = scmp.ne.s32.totalorder %s675_s5, %s448_s17  ;;  %p452_p4 = scmp.lt.u32.totalorder %s448_s17, %s675_s5 }
  0x8a   :  { %p454_p5 = pnand %p452_p4, %p449_p3 }
  0x8c   :  { %457 = shalt.err (!%p454_p5)
}
  0x8d   :  { %288 = dma.vmem_to_hbm [thread:$0]  %s283_s1, 256, %s675_s5, [#allocation4], %s473_s24, %s473_s24, %s474_s25  }
  0x8e   :  { %466 = dma.done.wait [#allocation4], 256  }
  0x8f   :  { %467 = vsyncadd [#allocation4], 4294967040 }
  0x90   :  { %292 = vsyncpa [#allocation3], 1 }
  0x91   :  { %293 = vsyncpa [#allocation4], 1 }
  0x92   :  { %294 = vsyncpa [#allocation5], 1 }
  0x93   :  { %295 = vsyncpa [#allocation6], 1 }
  0x94   :  { %296 = vsyncpa [#allocation9], 1 }

</bundles_post_ra>
